<compile_context>
chip_gen: v5e
topology: v5e:2x2
jax: 0.10.0
libtpu: 0.0.40
codegen_flags: <defaults>
</compile_context>

<pallas_src>
import jax
import jax.numpy as jnp
from jax.experimental import pallas as pl
from jax.experimental.pallas import tpu as pltpu

IMG_FEATS = 784        # 28 * 28 * 1
LAB_FEATS = 10
N_PAD = 128            # internal accumulator width (MXU lane-dense); real output width = 1
MAX_TILE_B = 2048      # batch-tile rows; big tiles amortize per-grid-step overhead


# ----------------------------- Pallas kernel ------------------------------- #

def linreg_kernel(x_ref, lab_ref, wx_ref, wl_ref, b_ref, o_ref):
    """One batch tile of: cat([x, label], 1) @ W + b  (concat == split-weight sum).

    x_ref  : (TB, 784)   flattened image tile (native dtype; cast in-kernel)
    lab_ref: (TB, 10)    one-hot label tile
    wx_ref : (784, 128)  image part of the Linear weight, zero-padded to N=128 (resident)
    wl_ref : (10, 128)   label part of the Linear weight, zero-padded to N=128 (resident)
    b_ref  : (1, 1)      bias (resident)
    o_ref  : (TB, 1)     output logits (only the real column is written to HBM)
    """
    x = x_ref[...].astype(jnp.float32)            # in-kernel cast: free VPU filler
    lab = lab_ref[...].astype(jnp.float32)
    acc = jnp.dot(x, wx_ref[...], preferred_element_type=jnp.float32)
    acc = acc + jnp.dot(lab, wl_ref[...], preferred_element_type=jnp.float32)
    # Keep the 128-wide accumulator internal; store only the real output column.
    o_ref[...] = (acc[:, :1] + b_ref[...]).astype(o_ref.dtype)


# ------------------------------- wrapper ------------------------------------ #

def _round_up(n, m):
    return ((n + m - 1) // m) * m


@jax.jit
def linreg_forward(params, x, one_hot_label):
    """Pallas forward.  x: (B, 1, 28, 28) or (B, 784); one_hot_label: (B, 10)."""
    B = x.shape[0]
    x_flat = x.reshape(B, -1)                      # torch .view(B, -1): metadata only
    label = one_hot_label

    # Tiny-batch guard: keep at least one full sublane so the single block never
    # exceeds the array.  For B >= 8 this is a no-op (no extra HBM pass).
    b_eff = max(B, 8)
    if b_eff != B:
        x_flat = jnp.pad(x_flat, ((0, b_eff - B), (0, 0)))
        label = jnp.pad(label, ((0, b_eff - B), (0, 0)))

    # Large batch tiles (amortize per-step overhead), but capped at ceil(B/2) so
    # big batches always split into >= 2 tiles (keeps both v7x TensorCores busy).
    half = -(-b_eff // 2)
    tile_b = min(MAX_TILE_B, max(8, _round_up(half, 8)))
    grid = (pl.cdiv(b_eff, tile_b),)               # last tile may be partial (masked)

    wx, wl, b = params["wx_pad"], params["wl_pad"], params["b11"]

    out = pl.pallas_call(
        linreg_kernel,
        out_shape=jax.ShapeDtypeStruct((b_eff, 1), jnp.float32),
        grid=grid,
        in_specs=[
            pl.BlockSpec((tile_b, IMG_FEATS), lambda i: (i, 0)),
            pl.BlockSpec((tile_b, LAB_FEATS), lambda i: (i, 0)),
            pl.BlockSpec((IMG_FEATS, N_PAD), lambda i: (0, 0)),   # resident weights
            pl.BlockSpec((LAB_FEATS, N_PAD), lambda i: (0, 0)),   # resident weights
            pl.BlockSpec((1, 1), lambda i: (0, 0)),               # resident bias
        ],
        out_specs=pl.BlockSpec((tile_b, 1), lambda i: (i, 0)),
        compiler_params=pltpu.CompilerParams(
            dimension_semantics=("parallel",),     # shard batch tiles across TCs (v7x)
        ),
    )(x_flat, label, wx, wl, b)

    return out if b_eff == B else out[:B]          # (B, 1)


# ----------------------------- params / init -------------------------------- #

def init_params(key):
    """torch nn.Linear(784 + 10, 1): weight (1, 794), bias (1,).

    One-time host-side prep: transpose to (794, 1), split into the image/label
    parts (split-weight == concat matmul), and zero-pad the output dim to 128 so
    the in-kernel matmul is lane-dense.  Only column 0 is ever written to HBM.
    """
    kw, kb = jax.random.split(key, 2)
    s = 0.05
    w = s * jax.random.normal(kw, (1, IMG_FEATS + LAB_FEATS), jnp.float32)  # torch layout
    bias = s * jax.random.normal(kb, (1,), jnp.float32)

    w_t = w.T                                                   # (794, 1)
    wx = w_t[:IMG_FEATS]                                        # (784, 1)
    wl = w_t[IMG_FEATS:]                                        # (10, 1)
    return {
        "w": w,
        "b": bias,
        "wx_pad": jnp.pad(wx, ((0, 0), (0, N_PAD - 1))),        # (784, 128)
        "wl_pad": jnp.pad(wl, ((0, 0), (0, N_PAD - 1))),        # (10, 128)
        "b11": bias.reshape(1, 1),                              # (1, 1)
    }


def reference_forward(params, x, one_hot_label):
    """Pure-JAX mirror of the torch forward (for verification)."""
    B = x.shape[0]
    x_flat = x.reshape(B, -1).astype(jnp.float32)
    combined = jnp.concatenate([x_flat, one_hot_label.astype(jnp.float32)], axis=1)
    return combined @ params["w"].T + params["b"].reshape(1, 1)  # (B, 1)


# --------------------------------- main -------------------------------------- #

if __name__ == "__main__":
    key = jax.random.PRNGKey(0)
    kx, kl, kp = jax.random.split(key, 3)

    B = 2
    x = jax.random.normal(kx, (B, 1, 28, 28), jnp.float32)       # MNIST-shaped, NCHW
    labels = jax.random.randint(kl, (B,), 0, 10)
    one_hot = jax.nn.one_hot(labels, 10, dtype=jnp.float32)      # (B, 10)

    params = init_params(kp)

    out = jax.block_until_ready(linreg_forward(params, x, one_hot))
    assert out.shape == (B, 1), out.shape

    ref = jax.block_until_ready(reference_forward(params, x, one_hot))
    assert jnp.allclose(out, ref, rtol=1e-5, atol=1e-5), (out, ref)

    print("KERNEL_OK")
</pallas_src>

<mosaic_0001>
module attributes {stable_mosaic.version = 11 : i64} {
  func.func @linreg_kernel(%arg0: i32, %arg1: memref<8x784xf32, #tpu.memory_space<vmem>>, %arg2: memref<8x10xf32, #tpu.memory_space<vmem>>, %arg3: memref<784x128xf32, #tpu.memory_space<vmem>>, %arg4: memref<10x128xf32, #tpu.memory_space<vmem>>, %arg5: memref<1x1xf32, #tpu.memory_space<vmem>>, %arg6: memref<8x1xf32, #tpu.memory_space<vmem>>) attributes {dimension_semantics = [#tpu.dimension_semantics<parallel>], iteration_bounds = array<i64: 1>, scalar_prefetch = 0 : i64, scratch_operands = 0 : i64, tpu.core_type = #tpu.core_type<tc>, window_params = [{transform_indices = @transform_0, window_bounds = array<i64: 8, 784>}, {transform_indices = @transform_1, window_bounds = array<i64: 8, 10>}, {pipeline_mode = #tpu.pipeline_mode<synchronous>, transform_indices = @transform_2, window_bounds = array<i64: 784, 128>}, {pipeline_mode = #tpu.pipeline_mode<synchronous>, transform_indices = @transform_3, window_bounds = array<i64: 10, 128>}, {pipeline_mode = #tpu.pipeline_mode<synchronous>, transform_indices = @transform_4, window_bounds = array<i64: 1, 1>}, {transform_indices = @transform_5, window_bounds = array<i64: 8, 1>}]} {
    %c0 = arith.constant 0 : index
    %c0_0 = arith.constant 0 : index
    %0 = vector.load %arg1[%c0, %c0_0] : memref<8x784xf32, #tpu.memory_space<vmem>>, vector<8x784xf32>
    %c0_1 = arith.constant 0 : index
    %c0_2 = arith.constant 0 : index
    %1 = vector.load %arg2[%c0_1, %c0_2] : memref<8x10xf32, #tpu.memory_space<vmem>>, vector<8x10xf32>
    %c0_3 = arith.constant 0 : index
    %c0_4 = arith.constant 0 : index
    %2 = vector.load %arg3[%c0_3, %c0_4] : memref<784x128xf32, #tpu.memory_space<vmem>>, vector<784x128xf32>
    %cst = arith.constant dense<0.000000e+00> : vector<8x128xf32>
    %3 = tpu.matmul %0, %2, %cst {dimension_numbers = #tpu.dot_dimension_numbers<[1], [0], [0], [1], [0, 0, 1, 1], [], []>} : vector<8x784xf32>, vector<784x128xf32>, vector<8x128xf32> -> vector<8x128xf32>
    %c0_5 = arith.constant 0 : index
    %c0_6 = arith.constant 0 : index
    %4 = vector.load %arg4[%c0_5, %c0_6] : memref<10x128xf32, #tpu.memory_space<vmem>>, vector<10x128xf32>
    %cst_7 = arith.constant dense<0.000000e+00> : vector<8x128xf32>
    %5 = tpu.matmul %1, %4, %cst_7 {dimension_numbers = #tpu.dot_dimension_numbers<[1], [0], [0], [1], [0, 0, 1, 1], [], []>} : vector<8x10xf32>, vector<10x128xf32>, vector<8x128xf32> -> vector<8x128xf32>
    %6 = arith.addf %3, %5 : vector<8x128xf32>
    %7 = vector.extract_strided_slice %6 {offsets = [0, 0], sizes = [8, 1], strides = [1, 1]} : vector<8x128xf32> to vector<8x1xf32>
    %c0_8 = arith.constant 0 : index
    %c0_9 = arith.constant 0 : index
    %8 = vector.load %arg5[%c0_8, %c0_9] : memref<1x1xf32, #tpu.memory_space<vmem>>, vector<1x1xf32>
    %9 = vector.broadcast %8 : vector<1x1xf32> to vector<8x1xf32>
    %10 = arith.addf %7, %9 : vector<8x1xf32>
    %c0_10 = arith.constant 0 : index
    %c0_11 = arith.constant 0 : index
    %11 = vector.load %arg6[%c0_10, %c0_11] : memref<8x1xf32, #tpu.memory_space<vmem>>, vector<8x1xf32>
    tpu.vector_store %arg6[%c0_10, %c0_11], %10 {strides = array<i32>} : memref<8x1xf32, #tpu.memory_space<vmem>>, vector<8x1xf32>,
    return
  }
  func.func @transform_0(%arg0: i32) -> (i32, i32) {
    %c0_i32 = arith.constant 0 : i32
    %c0_i32_0 = arith.constant 0 : i32
    return %arg0, %c0_i32 : i32, i32
  }
  func.func @transform_1(%arg0: i32) -> (i32, i32) {
    %c0_i32 = arith.constant 0 : i32
    %c0_i32_0 = arith.constant 0 : i32
    return %arg0, %c0_i32 : i32, i32
  }
  func.func @transform_2(%arg0: i32) -> (i32, i32) {
    %c0_i32 = arith.constant 0 : i32
    %c0_i32_0 = arith.constant 0 : i32
    %c0_i32_1 = arith.constant 0 : i32
    return %c0_i32, %c0_i32_0 : i32, i32
  }
  func.func @transform_3(%arg0: i32) -> (i32, i32) {
    %c0_i32 = arith.constant 0 : i32
    %c0_i32_0 = arith.constant 0 : i32
    %c0_i32_1 = arith.constant 0 : i32
    return %c0_i32, %c0_i32_0 : i32, i32
  }
  func.func @transform_4(%arg0: i32) -> (i32, i32) {
    %c0_i32 = arith.constant 0 : i32
    %c0_i32_0 = arith.constant 0 : i32
    %c0_i32_1 = arith.constant 0 : i32
    return %c0_i32, %c0_i32_0 : i32, i32
  }
  func.func @transform_5(%arg0: i32) -> (i32, i32) {
    %c0_i32 = arith.constant 0 : i32
    %c0_i32_0 = arith.constant 0 : i32
    return %arg0, %c0_i32 : i32, i32
  }
}

</mosaic_0001>

<bundles_post_ra>
// kernel: linreg_forward.1
= control target key start
LH: loop header
LB: loop body
LE: loop exit
PB: predicated region body
PF: predicated region fallthrough
CT: control target
= control target key end

     0   :  { %s435_s0 = inlined_call_operand.vmem [shape: f32[8,784], index: 0, kind: input, shape index: {}]   ;;  %s436_s1 = inlined_call_operand.vmem [shape: f32[8,10], index: 1, kind: input, shape index: {}]   ;;  %s437_s2 = inlined_call_operand.hbm [shape: f32[784,128], index: 2, kind: input, shape index: {}]   ;;  %s438_s3 = inlined_call_operand.vmem [shape: f32[10,128], index: 3, kind: input, shape index: {}]   ;;  %s439_s4 = inlined_call_operand.<no memory space> [shape: f32[1,1], index: 4, kind: input, shape index: {}]   ;;  %s440_s5 = inlined_call_operand.vmem [shape: f32[8,1], index: 5, kind: output, shape index: {}]  }
   0x1   :  { %v10_v0 = vstv %s439_s4 }
   0x2   :  { %11 = vst [vmem:[#allocation2] sm:$0x1] %v10_v0 }
   0x3   :  { %12 = vsyncpa [#allocation4], 0  ;;  %s21_s22 = sshll.u32 %s437_s2, 4  ;;  %s363_s23 = smov [#allocation3]   ;;  %s22_s22 = int_to_ptr.hbm [resolvable:$true] %s21_s22 }
   0x4   :  { %s23_s24 = sshll.u32 %s363_s23, 4  ;;  %s364_s25 = smov 128   ;;  %s24_s24 = int_to_ptr.vmem [resolvable:$true] %s23_s24 }
   0x5   :  { %s365_s26 = smov 8  }
   0x6   :  { %29 = dma.hbm_to_vmem [thread:$0]  %s22_s22, 12544, %s24_s24, [#allocation4], %s364_s25, %s364_s25, %s365_s26  }
   0x7   :  { %361 = dma.done.wait [#allocation4], 12544  }
   0x8   :  { %362 = vsyncadd [#allocation4], 4294954752  ;;  %v77_v1 = vld [vmem:[#allocation3 + $0xf8] sm:$0xff]  ;;  %v76_v3 = vld [vmem:[#allocation3 + $0xf0] sm:$0xff]  ;;  %vm150_vm0 = vcmask 1041408   ;;  %vm146_vm1 = vcmask 80896  }
   0x9   :  { %v61_v2 = vld [vmem:[#allocation3 + $0x78] sm:$0xff]  ;;  %198 = vmatpush.msra.mxu2 %v77_v1  ;;  %v60_v4 = vld [vmem:[#allocation3 + $0x70] sm:$0xff]  ;;  %v75_v5 = vld [vmem:[#allocation3 + $0xe8] sm:$0xff]  ;;  %vm174_vm2 = vcmask 130048   ;;  %vm323_vm3 = vcmask 7168  }
   0xa   :  { %178 = vmatpush.msra.mxu1 %v61_v2  ;;  %v59_v6 = vld [vmem:[#allocation3 + $0x68] sm:$0xff]  ;;  %v74_v7 = vld [vmem:[#allocation3 + $0xe0] sm:$0xff]  ;;  %v73_v9 = vld [vmem:[#allocation3 + $0xd8] sm:$0xff] }
   0xb   :  { %199 = vmatpush.msra.mxu2 %v76_v3  ;;  %v58_v8 = vld [vmem:[#allocation3 + $0x60] sm:$0xff]  ;;  %v57_v10 = vld [vmem:[#allocation3 + $0x58] sm:$0xff]  ;;  %v72_v12 = vld [vmem:[#allocation3 + $0xd0] sm:$0xff] }
   0xc   :  { %179 = vmatpush.msra.mxu1 %v60_v4  ;;  %v93_v11 = vld [vmem:[#allocation3 + $0x178] sm:$0xff]  ;;  %v56_v13 = vld [vmem:[#allocation3 + $0x50] sm:$0xff]  ;;  %v91_v15 = vld [vmem:[#allocation3 + $0x168] sm:$0xff] }
   0xd   :  { %200 = vmatpush.msra.mxu2 %v75_v5  ;;  %218 = vmatpush.msra.mxu3 %v93_v11  ;;  %v92_v14 = vld [vmem:[#allocation3 + $0x170] sm:$0xff]  ;;  %v71_v16 = vld [vmem:[#allocation3 + $0xc8] sm:$0xff]  ;;  %v90_v19 = vld [vmem:[#allocation3 + $0x160] sm:$0xff] }
   0xe   :  { %180 = vmatpush.msra.mxu1 %v59_v6  ;;  %v55_v17 = vld [vmem:[#allocation3 + $0x48] sm:$0xff]  ;;  %v144_v20 = vld [vmem:[%s438_s3] sm:$0xff]  ;;  %v88_v27 = vld [vmem:[#allocation3 + $0x150] sm:$0xff] }
   0xf   :  { %201 = vmatpush.msra.mxu2 %v74_v7  ;;  %219 = vmatpush.msra.mxu3 %v92_v14  ;;  %v145_v18 = vld [vmem:[%s438_s3 + $0x8] sm:$0x3]  ;;  %v89_v23 = vld [vmem:[#allocation3 + $0x158] sm:$0xff]  ;;  %v108_v28 = vld [vmem:[#allocation3 + $0x1f0] sm:$0xff] }
  0x10   :  { %181 = vmatpush.msra.mxu1 %v58_v8  ;;  %v70_v21 = vld [vmem:[#allocation3 + $0xc0] sm:$0xff]  ;;  %330 = vmatpush.msk.msra.mxu0 %vm150_vm0, %v145_v18  ;;  %v109_v24 = vld [vmem:[#allocation3 + $0x1f8] sm:$0xff]  ;;  %v68_v29 = vld [vmem:[#allocation3 + $0xb0] sm:$0xff] }
  0x11   :  { %202 = vmatpush.msra.mxu2 %v73_v9  ;;  %v54_v22 = vld [vmem:[#allocation3 + $0x40] sm:$0xff]  ;;  %220 = vmatpush.msra.mxu3 %v91_v15  ;;  %v69_v25 = vld [vmem:[#allocation3 + $0xb8] sm:$0xff]  ;;  %v52_v30 = vld [vmem:[#allocation3 + $0x30] sm:$0xff] }
  0x12   :  { %182 = vmatpush.msra.mxu1 %v57_v10  ;;  %v53_v26 = vld [vmem:[#allocation3 + $0x38] sm:$0xff]  ;;  %169 = vmatpush.msra.mxu0 %v144_v20  ;;  %v87_v31 = vld [vmem:[#allocation3 + $0x148] sm:$0xff]  ;;  %v86_v35 = vld [vmem:[#allocation3 + $0x140] sm:$0xff] }
  0x13   :  { %203 = vmatpush.msra.mxu2 %v72_v12  ;;  %221 = vmatpush.msra.mxu3 %v90_v19  ;;  %v107_v32 = vld [vmem:[#allocation3 + $0x1e8] sm:$0xff]  ;;  %v106_v36 = vld [vmem:[#allocation3 + $0x1e0] sm:$0xff]  ;;  %v85_v39 = vld [vmem:[#allocation3 + $0x138] sm:$0xff] }
  0x14   :  { %183 = vmatpush.msra.mxu1 %v56_v13  ;;  %238 = vmatpush.msrb.mxu0 %v109_v24  ;;  %v67_v33 = vld [vmem:[#allocation3 + $0xa8] sm:$0xff]  ;;  %v66_v37 = vld [vmem:[#allocation3 + $0xa0] sm:$0xff]  ;;  %v105_v40 = vld [vmem:[#allocation3 + $0x1d8] sm:$0xff] }
  0x15   :  { %204 = vmatpush.msra.mxu2 %v71_v16  ;;  %222 = vmatpush.msra.mxu3 %v89_v23  ;;  %v51_v34 = vld [vmem:[#allocation3 + $0x28] sm:$0xff]  ;;  %v50_v38 = vld [vmem:[#allocation3 + $0x20] sm:$0xff]  ;;  %v65_v41 = vld [vmem:[#allocation3 + $0x98] sm:$0xff] }
  0x16   :  { %184 = vmatpush.msra.mxu1 %v55_v17  ;;  %239 = vmatpush.msrb.mxu0 %v108_v28  ;;  %v49_v42 = vld [vmem:[#allocation3 + $0x18] sm:$0xff]  ;;  %v84_v43 = vld [vmem:[#allocation3 + $0x130] sm:$0xff]  ;;  %v83_v47 = vld [vmem:[#allocation3 + $0x128] sm:$0xff] }
  0x17   :  { %205 = vmatpush.msra.mxu2 %v70_v21  ;;  %223 = vmatpush.msra.mxu3 %v88_v27  ;;  %v104_v44 = vld [vmem:[#allocation3 + $0x1d0] sm:$0xff]  ;;  %v103_v48 = vld [vmem:[#allocation3 + $0x1c8] sm:$0xff]  ;;  %v82_v51 = vld [vmem:[#allocation3 + $0x120] sm:$0xff] }
  0x18   :  { %185 = vmatpush.msra.mxu1 %v54_v22  ;;  %240 = vmatpush.msrb.mxu0 %v107_v32  ;;  %v64_v45 = vld [vmem:[#allocation3 + $0x90] sm:$0xff]  ;;  %v63_v49 = vld [vmem:[#allocation3 + $0x88] sm:$0xff]  ;;  %v102_v52 = vld [vmem:[#allocation3 + $0x1c0] sm:$0xff] }
  0x19   :  { %206 = vmatpush.msra.mxu2 %v69_v25  ;;  %224 = vmatpush.msra.mxu3 %v87_v31  ;;  %v48_v46 = vld [vmem:[#allocation3 + $0x10] sm:$0xff]  ;;  %v47_v50 = vld [vmem:[#allocation3 + $0x8] sm:$0xff]  ;;  %v62_v53 = vld [vmem:[#allocation3 + $0x80] sm:$0xff] }
  0x1a   :  { %186 = vmatpush.msra.mxu1 %v53_v26  ;;  %241 = vmatpush.msrb.mxu0 %v106_v36  ;;  %v46_v54 = vld [vmem:[#allocation3] sm:$0xff]  ;;  %v141_v55 = vld [vmem:[#allocation3 + $0x2f8] sm:$0xff]  ;;  %v140_v59 = vld [vmem:[#allocation3 + $0x2f0] sm:$0xff] }
  0x1b   :  { %207 = vmatpush.msra.mxu2 %v68_v29  ;;  %225 = vmatpush.msra.mxu3 %v86_v35  ;;  %v125_v56 = vld [vmem:[#allocation3 + $0x278] sm:$0xff]  ;;  %v124_v60 = vld [vmem:[#allocation3 + $0x270] sm:$0xff]  ;;  %v139_v63 = vld [vmem:[#allocation3 + $0x2e8] sm:$0xff] }
  0x1c   :  { %187 = vmatpush.msra.mxu1 %v52_v30  ;;  %242 = vmatpush.msrb.mxu0 %v105_v40  ;;  %v81_v57 = vld [vmem:[#allocation3 + $0x118] sm:$0xff]  ;;  %v80_v61 = vld [vmem:[#allocation3 + $0x110] sm:$0xff]  ;;  %v123_v0 = vld [vmem:[#allocation3 + $0x268] sm:$0xff] }
  0x1d   :  { %208 = vmatpush.msra.mxu2 %v67_v33  ;;  %226 = vmatpush.msra.mxu3 %v85_v39  ;;  %v101_v58 = vld [vmem:[#allocation3 + $0x1b8] sm:$0xff]  ;;  %v100_v62 = vld [vmem:[#allocation3 + $0x1b0] sm:$0xff]  ;;  %v79_v1 = vld [vmem:[#allocation3 + $0x108] sm:$0xff] }
  0x1e   :  { %188 = vmatpush.msra.mxu1 %v51_v34  ;;  %243 = vmatpush.msrb.mxu0 %v104_v44  ;;  %v99_v2 = vld [vmem:[#allocation3 + $0x1a8] sm:$0xff]  ;;  %v138_v3 = vld [vmem:[#allocation3 + $0x2e0] sm:$0xff]  ;;  %v137_v7 = vld [vmem:[#allocation3 + $0x2d8] sm:$0xff] }
  0x1f   :  { %209 = vmatpush.msra.mxu2 %v66_v37  ;;  %227 = vmatpush.msra.mxu3 %v84_v43  ;;  %v122_v4 = vld [vmem:[#allocation3 + $0x260] sm:$0xff]  ;;  %v121_v8 = vld [vmem:[#allocation3 + $0x258] sm:$0xff]  ;;  %v40_v10 = vld [vmem:[%s435_s0 + $0x10] sm:$0xff] }
  0x20   :  { %189 = vmatpush.msra.mxu1 %v50_v38  ;;  %244 = vmatpush.msrb.mxu0 %v103_v48  ;;  %v39_v5 = vld [vmem:[%s435_s0 + $0x8] sm:$0xff]  ;;  %v136_v11 = vld [vmem:[#allocation3 + $0x2d0] sm:$0xff]  ;;  %v45_v13 = vld [vmem:[%s436_s1] sm:$0xff] }
  0x21   :  { %210 = vmatpush.msra.mxu2 %v65_v41  ;;  %228 = vmatpush.msra.mxu3 %v83_v47  ;;  %v78_v6 = vld [vmem:[#allocation3 + $0x100] sm:$0xff]  ;;  %v120_v12 = vld [vmem:[#allocation3 + $0x250] sm:$0xff]  ;;  %v135_v15 = vld [vmem:[#allocation3 + $0x2c8] sm:$0xff] }
  0x22   :  { %190 = vmatpush.msra.mxu1 %v49_v42  ;;  %245 = vmatpush.msrb.mxu0 %v102_v52  ;;  %v98_v9 = vld [vmem:[#allocation3 + $0x1a0] sm:$0xff]  ;;  %v119_v16 = vld [vmem:[#allocation3 + $0x248] sm:$0xff]  ;;  %v97_v17 = vld [vmem:[#allocation3 + $0x198] sm:$0xff] }
  0x23   :  { %211 = vmatpush.msra.mxu2 %v64_v45  ;;  %229 = vmatpush.msra.mxu3 %v82_v51  ;;  %v38_v14 = vld [vmem:[%s435_s0] sm:$0xff]  ;;  %v143_v18 = vld [vmem:[#allocation3 + $0x308] sm:$0xff]  ;;  %v96_v21 = vld [vmem:[#allocation3 + $0x190] sm:$0xff] }
  0x24   :  { %191 = vmatpush.msra.mxu1 %v48_v46  ;;  %246 = vmatpush.msrb.mxu0 %v101_v58  ;;  %v134_v19 = vld [vmem:[#allocation3 + $0x2c0] sm:$0xff]  ;;  %v133_v23 = vld [vmem:[#allocation3 + $0x2b8] sm:$0xff]  ;;  %v95_v25 = vld [vmem:[#allocation3 + $0x188] sm:$0xff] }
  0x25   :  { %212 = vmatpush.msra.mxu2 %v63_v49  ;;  %230 = vmatpush.msra.mxu3 %v81_v57  ;;  %v118_v20 = vld [vmem:[#allocation3 + $0x240] sm:$0xff]  ;;  %v117_v24 = vld [vmem:[#allocation3 + $0x238] sm:$0xff]  ;;  %v44_v26 = vld [vmem:[%s435_s0 + $0x30] sm:$0xff] }
  0x26   :  { %192 = vmatpush.msra.mxu1 %v47_v50  ;;  %247 = vmatpush.msrb.mxu0 %v100_v62  ;;  %v142_v22 = vld [vmem:[#allocation3 + $0x300] sm:$0xff]  ;;  %v132_v27 = vld [vmem:[#allocation3 + $0x2b0] sm:$0xff]  ;;  %v131_v30 = vld [vmem:[#allocation3 + $0x2a8] sm:$0xff] }
  0x27   :  { %213 = vmatpush.msra.mxu2 %v62_v53  ;;  %231 = vmatpush.msra.mxu3 %v80_v61  ;;  %v116_v28 = vld [vmem:[#allocation3 + $0x230] sm:$0xff]  ;;  %v94_v29 = vld [vmem:[#allocation3 + $0x180] sm:$0xff]  ;;  %v115_v31 = vld [vmem:[#allocation3 + $0x228] sm:$0xff] }
  0x28   :  { %193 = vmatpush.msra.mxu1 %v46_v54  ;;  %248 = vmatpush.msrb.mxu0 %v99_v2  ;;  %v41_v32 = vld [vmem:[%s435_s0 + $0x18] sm:$0xff]  ;;  %v130_v33 = vld [vmem:[#allocation3 + $0x2a0] sm:$0xff]  ;;  %v127_v39 = vld [vmem:[#allocation3 + $0x288] sm:$0xff] }
  0x29   :  { %278 = vmatpush.msrb.mxu2 %v141_v55  ;;  %232 = vmatpush.msra.mxu3 %v79_v1  ;;  %v114_v34 = vld [vmem:[#allocation3 + $0x220] sm:$0xff]  ;;  %v129_v35 = vld [vmem:[#allocation3 + $0x298] sm:$0xff]  ;;  %v128_v37 = vld [vmem:[#allocation3 + $0x290] sm:$0xff] }
  0x2a   :  { %258 = vmatpush.msrb.mxu1 %v125_v56  ;;  %214 = vmatmul.f32.vlgmr.msra.gmra.mxu2 %v39_v5  ;;  %v113_v36 = vld [vmem:[#allocation3 + $0x218] sm:$0xff]  ;;  %v112_v38 = vld [vmem:[#allocation3 + $0x210] sm:$0xff]  ;;  %v111_v40 = vld [vmem:[#allocation3 + $0x208] sm:$0xff] }
  0x2b   :  { %279 = vmatpush.msrb.mxu2 %v140_v59  ;;  %233 = vmatpush.msra.mxu3 %v78_v6  ;;  %v126_v41 = vld [vmem:[#allocation3 + $0x280] sm:$0xff]  ;;  %v336_v59 = vld [vmem:[#allocation2] ss:$0 sm:$0xff] }
  0x2c   :  { %259 = vmatpush.msrb.mxu1 %v124_v60  ;;  %249 = vmatpush.msrb.mxu0 %v98_v9  ;;  %v110_v42 = vld [vmem:[#allocation3 + $0x200] sm:$0xff] }
  0x2d   :  { %280 = vmatpush.msrb.mxu2 %v139_v63  ;;  %234 = vmatmul.f32.vlgmr.msra.gmra.mxu3 %v40_v10  ;;  %v43_v43 = vld [vmem:[%s435_s0 + $0x28] sm:$0xff]  ;;  %v42_v44 = vld [vmem:[%s435_s0 + $0x20] sm:$0xff] }
  0x2e   :  { %260 = vmatpush.msrb.mxu1 %v123_v0  ;;  %331 = vmatmul.msk.f32.vlgmr.msra.gmra.mxu0 %vm146_vm1, %v45_v13 }
  0x2f   :  { %281 = vmatpush.msrb.mxu2 %v138_v3  ;;  %194 = vmatmul.f32.vlgmr.msra.gmra.mxu1 %v38_v14 }
  0x30   :  { %261 = vmatpush.msrb.mxu1 %v122_v4  ;;  %250 = vmatpush.msrb.mxu0 %v97_v17 }
  0x31   :  { %282 = vmatpush.msrb.mxu2 %v137_v7  ;;  %312 = vmatpush.msrb.mxu3 %v143_v18 }
  0x32   :  { %262 = vmatpush.msrb.mxu1 %v121_v8  ;;  %251 = vmatpush.msrb.mxu0 %v96_v21 }
  0x33   :  { %283 = vmatpush.msrb.mxu2 %v136_v11  ;;  %313 = vmatpush.msrb.mxu3 %v142_v22 }
  0x34   :  { %263 = vmatpush.msrb.mxu1 %v120_v12  ;;  %252 = vmatpush.msrb.mxu0 %v95_v25 }
  0x35   :  { %284 = vmatpush.msrb.mxu2 %v135_v15  ;;  %332 = vmatmul.msk.f32.vlgmr.msrb.gmra.mxu3 %vm174_vm2, %v44_v26 }
  0x36   :  { %264 = vmatpush.msrb.mxu1 %v119_v16  ;;  %253 = vmatpush.msrb.mxu0 %v94_v29 }
  0x37   :  { %285 = vmatpush.msrb.mxu2 %v134_v19  ;;  %254 = vmatmul.f32.vlgmr.msrb.gmra.mxu0 %v41_v32 }
  0x38   :  { %265 = vmatpush.msrb.mxu1 %v118_v20 }
  0x39   :  { %286 = vmatpush.msrb.mxu2 %v133_v23 }
  0x3a   :  { %266 = vmatpush.msrb.mxu1 %v117_v24 }
  0x3b   :  { %287 = vmatpush.msrb.mxu2 %v132_v27 }
  0x3c   :  { %267 = vmatpush.msrb.mxu1 %v116_v28 }
  0x3d   :  { %288 = vmatpush.msrb.mxu2 %v131_v30 }
  0x3e   :  { %268 = vmatpush.msrb.mxu1 %v115_v31 }
  0x3f   :  { %289 = vmatpush.msrb.mxu2 %v130_v33 }
  0x40   :  { %269 = vmatpush.msrb.mxu1 %v114_v34 }
  0x41   :  { %290 = vmatpush.msrb.mxu2 %v129_v35 }
  0x42   :  { %270 = vmatpush.msrb.mxu1 %v113_v36 }
  0x43   :  { %291 = vmatpush.msrb.mxu2 %v128_v37 }
  0x44   :  { %271 = vmatpush.msrb.mxu1 %v112_v38 }
  0x45   :  { %292 = vmatpush.msrb.mxu2 %v127_v39 }
  0x46   :  { %272 = vmatpush.msrb.mxu1 %v111_v40 }
  0x47   :  { %293 = vmatpush.msrb.mxu2 %v126_v41 }
  0x48   :  { %273 = vmatpush.msrb.mxu1 %v110_v42  ;;  %294 = vmatmul.f32.vlgmr.msrb.gmra.mxu2 %v43_v43 }
  0x49   :  { %274 = vmatmul.f32.vlgmr.msrb.gmra.mxu1 %v42_v44 }
  0xab   :  { %v171_v46 = vpop.f32.mrf.mxu0 }
  0xac   :  { %v195_v45 = vpop.f32.mrf.mxu1 }
  0xad   :  { %v196_v47 = vadd.f32 %v195_v45, %v171_v46  ;;  %v215_v48 = vpop.f32.mrf.mxu2 }
  0xaf   :  { %v216_v49 = vadd.f32 %v215_v48, %v196_v47 }
  0xb0   :  { %v235_v50 = vpop.f32.mrf.mxu3 }
  0xb1   :  { %v236_v51 = vadd.f32 %v235_v50, %v216_v49 }
  0xb4   :  { %v255_v52 = vpop.f32.mrf.mxu0 }
  0xb5   :  { %v256_v53 = vadd.f32 %v255_v52, %v236_v51 }
  0xb8   :  { %v315_v57 = vpop.f32.mrf.mxu3 }
  0xc6   :  { %v275_v54 = vpop.f32.mrf.mxu1 }
  0xc7   :  { %v276_v55 = vadd.f32 %v275_v54, %v256_v53 }
  0xcb   :  { %v295_v56 = vpop.f32.mrf.mxu2 }
  0xcc   :  { %v296_v58 = vadd.f32 %v295_v56, %v276_v55 }
  0xce   :  { %v316_v60 = vadd.f32 %v315_v57, %v296_v58 }
  0xd0   :  { %v322_v61 = vadd.f32 %v336_v59, %v316_v60 }
  0xd2   :  { %324 = vst.msk [vmem:[%s440_s5] sm:$0xff] %vm323_vm3, %v322_v61 }
  0xd3   :  { %329 = vsyncpa [#allocation4], 1 }

</bundles_post_ra>
